<compile_context>
chip_gen: v7x
topology: tpu7x:2x2x1
jax: 0.10.0
libtpu: 0.0.40
codegen_flags: <defaults>
</compile_context>

<pallas_src>
import functools

import jax
import jax.numpy as jnp
from jax import lax
from jax.experimental import pallas as pl
from jax.experimental.pallas import tpu as pltpu


def _round_up(x, m):
    return ((x + m - 1) // m) * m


def _contrastive_kernel(o1_ref, o2_ref, lab_ref, out_ref, acc_ref, *,
                        margin, eps, b_real, tiles_per_core, needs_mask):
    c = pl.program_id(0)            # partial-sum / core index ("parallel")
    k = pl.program_id(1)            # row-tile index           ("arbitrary")

    @pl.when(k == 0)
    def _init():
        acc_ref[...] = jnp.zeros_like(acc_ref)

    # F.pairwise_distance: ||(x1 - x2) + eps||_2 along the feature dim.
    o1 = o1_ref[...].astype(jnp.float32)
    o2 = o2_ref[...].astype(jnp.float32)
    diff = (o1 - o2) + eps
    dist2 = jnp.sum(diff * diff, axis=-1, keepdims=True)          # (TB, 1)
    dist = jnp.sqrt(dist2)                                         # (TB, 1)

    lab = lab_ref[...].astype(jnp.float32)                         # (TB, 1)

    # (1 - label) * dist^2 + label * clamp(margin - dist, min=0)^2
    hinge = jnp.maximum(margin - dist, 0.0)
    loss = (1.0 - lab) * dist2 + lab * (hinge * hinge)             # (TB, 1)

    if needs_mask:
        # Mask ragged-tail / phantom-tile rows BEFORE accumulation.  Row
        # indices are computed from the *unclamped* tile index, so phantom
        # tiles (which re-read the last real tile) contribute exactly zero.
        tb = loss.shape[0]
        row = (lax.broadcasted_iota(jnp.int32, loss.shape, 0)
               + (c * tiles_per_core + k) * tb)
        loss = jnp.where(row < b_real, loss, 0.0)

    # Per-row accumulation: no cross-sublane reduce inside the hot loop.
    acc_ref[...] += loss

    @pl.when(k == pl.num_programs(1) - 1)
    def _finalize():
        total = jnp.sum(acc_ref[...], axis=0, keepdims=True)       # (1, 1)
        out_ref[...] = total.reshape(1, 1, 1)


def contrastive_loss(objective, output1, output2, label,
                     margin_similar=1.0, margin_compatible=1.0,
                     block_rows=None):
    """JAX/Pallas equivalent of ContrastiveLoss.forward.

    `objective` is a static Python string ('S' selects margin_similar,
    anything else selects margin_compatible), exactly as in the reference.
    Note: the reference computes `coeff` but never applies it to the loss,
    so we do not apply it either.
    """
    margin = margin_similar if objective == 'S' else margin_compatible
    eps = 1e-6

    output1 = jnp.asarray(output1)
    output2 = jnp.asarray(output2)
    B, D = output1.shape
    itemsize = jnp.dtype(output1.dtype).itemsize

    # Sublane multiple for the input dtype (f32: 8, bf16: 16, int8/fp8: 32).
    sub = max(8, 32 // itemsize)

    # Row-tile size.  VMEM per row: 2 inputs x 2 pipeline buffers x D elems,
    # plus the lane-padded (TB, 1) f32 label (512 B/row per buffer) and the
    # (TB, 1) f32 accumulator scratch.  Budget ~16 MiB for the buffers and
    # set an explicit 32 MiB scoped-VMEM limit (safe on v5e/v6e/v7x).
    if block_rows is None:
        budget = 16 * 1024 * 1024
        bytes_per_row = 4 * D * itemsize + 3 * 512
        tb = budget // max(1, bytes_per_row)
        tb = max(sub, min(8192, (tb // sub) * sub))
    else:
        tb = max(sub, _round_up(int(block_rows), sub))
    tb = min(tb, _round_up(B, sub))

    total_tiles = pl.cdiv(B, tb)
    num_cores = 2 if total_tiles >= 2 else 1     # v7x megacore; harmless on 1-TC chips
    tiles_per_core = pl.cdiv(total_tiles, num_cores)
    needs_mask = (num_cores * tiles_per_core * tb != B)
    needs_clamp = (num_cores * tiles_per_core != total_tiles)
    last_block = total_tiles - 1

    def row_map(c, k):
        idx = c * tiles_per_core + k
        if needs_clamp:
            # Phantom tiles re-read the last real tile; their rows are
            # masked out inside the kernel.
            idx = jnp.minimum(idx, last_block)
        return (idx, 0)

    lab2d = jnp.asarray(label, jnp.float32).reshape(B, 1)

    kernel = functools.partial(
        _contrastive_kernel,
        margin=float(margin), eps=eps, b_real=B,
        tiles_per_core=tiles_per_core, needs_mask=needs_mask)

    cost = pl.CostEstimate(
        flops=int(3 * B * D + 12 * B),
        transcendentals=int(B),
        bytes_accessed=int(2 * B * D * itemsize + 4 * B + 4 * num_cores))

    partial_sums = pl.pallas_call(
        kernel,
        out_shape=jax.ShapeDtypeStruct((num_cores, 1, 1), jnp.float32),
        grid_spec=pltpu.PrefetchScalarGridSpec(
            num_scalar_prefetch=0,
            grid=(num_cores, tiles_per_core),
            in_specs=[
                pl.BlockSpec((tb, D), row_map),   # output1 (full-extent feature dim)
                pl.BlockSpec((tb, D), row_map),   # output2
                pl.BlockSpec((tb, 1), row_map),   # label
            ],
            out_specs=pl.BlockSpec((1, 1, 1), lambda c, k: (c, 0, 0)),
            scratch_shapes=[pltpu.VMEM((tb, 1), jnp.float32)],   # per-core row sums
        ),
        compiler_params=pltpu.CompilerParams(
            dimension_semantics=("parallel", "arbitrary"),
            vmem_limit_bytes=32 * 1024 * 1024),
        cost_estimate=cost,
    )(output1, output2, lab2d)

    # Combine the per-core partial sums and take the global mean.
    return jnp.sum(partial_sums) / jnp.float32(B)


def _reference(objective, output1, output2, label,
               margin_similar=1.0, margin_compatible=1.0):
    margin = margin_similar if objective == 'S' else margin_compatible
    eps = 1e-6
    d = jnp.sqrt(jnp.sum((output1 - output2 + eps) ** 2, axis=-1))
    x1 = 1.0 - label
    x2 = d ** 2
    x4 = jnp.maximum(margin - d, 0.0) ** 2
    return jnp.mean(x1 * x2 + label * x4)


if __name__ == "__main__":
    key = jax.random.PRNGKey(0)
    k1, k2, k3 = jax.random.split(key, 3)

    # Small shapes consistent with the module (a batch of embedding pairs).
    B, D = 8, 32
    output1 = jax.random.normal(k1, (B, D), dtype=jnp.float32)
    output2 = jax.random.normal(k2, (B, D), dtype=jnp.float32)
    label = jax.random.bernoulli(k3, 0.5, (B,)).astype(jnp.float32)

    loss_s = contrastive_loss('S', output1, output2, label,
                              margin_similar=1.0, margin_compatible=2.0)
    loss_c = contrastive_loss('C', output1, output2, label,
                              margin_similar=1.0, margin_compatible=2.0)
    jax.block_until_ready((loss_s, loss_c))

    ref_s = _reference('S', output1, output2, label, 1.0, 2.0)
    ref_c = _reference('C', output1, output2, label, 1.0, 2.0)
    assert jnp.allclose(loss_s, ref_s, rtol=1e-5, atol=1e-5), (loss_s, ref_s)
    assert jnp.allclose(loss_c, ref_c, rtol=1e-5, atol=1e-5), (loss_c, ref_c)

    # Ragged f32 case: single oversized block (56 > 50 rows) with row masking.
    B1, D1 = 50, 96
    o1a = jax.random.normal(k1, (B1, D1), dtype=jnp.float32)
    o2a = jax.random.normal(k2, (B1, D1), dtype=jnp.float32)
    lab1 = jax.random.bernoulli(k3, 0.5, (B1,)).astype(jnp.float32)
    loss_a = contrastive_loss('C', o1a, o2a, lab1, 1.0, 2.0)
    jax.block_until_ready(loss_a)
    ref_a = _reference('C', o1a, o2a, lab1, 1.0, 2.0)
    assert jnp.allclose(loss_a, ref_a, rtol=1e-5, atol=1e-5), (loss_a, ref_a)

    # Ragged bf16 case: multi-tile grid, two partial sums (grid (2, 2)),
    # phantom-tile clamping (3 real tiles) and row masking, D not a
    # multiple of 128 without any wrapper-side padding.
    B2, D2 = 37, 200
    o1b = jax.random.normal(k1, (B2, D2), dtype=jnp.bfloat16)
    o2b = jax.random.normal(k2, (B2, D2), dtype=jnp.bfloat16)
    lab2 = jax.random.bernoulli(k3, 0.5, (B2,)).astype(jnp.float32)
    loss_t = contrastive_loss('C', o1b, o2b, lab2, 1.0, 2.0, block_rows=16)
    jax.block_until_ready(loss_t)
    ref_t = _reference('C', o1b.astype(jnp.float32), o2b.astype(jnp.float32),
                       lab2, 1.0, 2.0)
    assert jnp.allclose(loss_t, ref_t, rtol=1e-4, atol=1e-5), (loss_t, ref_t)

    print("KERNEL_OK")
</pallas_src>

<mosaic_0001>
module attributes {stable_mosaic.version = 11 : i64} {
  func.func @_contrastive_kernel(%arg0: i32, %arg1: i32, %arg2: memref<8x32xf32, #tpu.memory_space<vmem>>, %arg3: memref<8x32xf32, #tpu.memory_space<vmem>>, %arg4: memref<8x1xf32, #tpu.memory_space<vmem>>, %arg5: memref<1x1x1xf32, #tpu.memory_space<vmem>>, %arg6: memref<8x1xf32, #tpu.memory_space<vmem>>) attributes {dimension_semantics = [#tpu.dimension_semantics<parallel>, #tpu.dimension_semantics<arbitrary>], iteration_bounds = array<i64: 1, 1>, scalar_prefetch = 0 : i64, scratch_operands = 1 : i64, tpu.core_type = #tpu.core_type<tc>, window_params = [{transform_indices = @transform_0, window_bounds = array<i64: 8, 32>}, {transform_indices = @transform_1, window_bounds = array<i64: 8, 32>}, {transform_indices = @transform_2, window_bounds = array<i64: 8, 1>}, {transform_indices = @transform_3, window_bounds = array<i64: 1, 1, 1>}]} {
    %c0_i32 = arith.constant 0 : i32
    %0 = arith.cmpi eq, %arg1, %c0_i32 : i32
    %1 = arith.extui %0 : i1 to i32
    %c0_i32_0 = arith.constant 0 : i32
    %2 = arith.cmpi ne, %1, %c0_i32_0 : i32
    scf.if %2 {
      %cst_16 = arith.constant 0.000000e+00 : f32
      %29 = vector.broadcast %cst_16 : f32 to vector<8x1xf32>
      %c0_17 = arith.constant 0 : index
      %c0_18 = arith.constant 0 : index
      %30 = vector.load %arg6[%c0_17, %c0_18] : memref<8x1xf32, #tpu.memory_space<vmem>>, vector<8x1xf32>
      tpu.vector_store %arg6[%c0_17, %c0_18], %29 {strides = array<i32>} : memref<8x1xf32, #tpu.memory_space<vmem>>, vector<8x1xf32>,
    } else {
    }
    %c0 = arith.constant 0 : index
    %c0_1 = arith.constant 0 : index
    %3 = vector.load %arg2[%c0, %c0_1] : memref<8x32xf32, #tpu.memory_space<vmem>>, vector<8x32xf32>
    %c0_2 = arith.constant 0 : index
    %c0_3 = arith.constant 0 : index
    %4 = vector.load %arg3[%c0_2, %c0_3] : memref<8x32xf32, #tpu.memory_space<vmem>>, vector<8x32xf32>
    %5 = arith.subf %3, %4 : vector<8x32xf32>
    %cst = arith.constant 9.99999997E-7 : f32
    %6 = vector.broadcast %cst : f32 to vector<8x32xf32>
    %7 = arith.addf %5, %6 : vector<8x32xf32>
    %8 = arith.mulf %7, %7 : vector<8x32xf32>
    %cst_4 = arith.constant dense<0.000000e+00> : vector<8xf32>
    %9 = vector.multi_reduction <add>, %8, %cst_4 [1] : vector<8x32xf32> to vector<8xf32>
    %10 = vector.shape_cast %9 : vector<8xf32> to vector<8x1xf32>
    %11 = math.sqrt %10 : vector<8x1xf32>
    %c0_5 = arith.constant 0 : index
    %c0_6 = arith.constant 0 : index
    %12 = vector.load %arg4[%c0_5, %c0_6] : memref<8x1xf32, #tpu.memory_space<vmem>>, vector<8x1xf32>
    %cst_7 = arith.constant 1.000000e+00 : f32
    %13 = vector.broadcast %cst_7 : f32 to vector<8x1xf32>
    %14 = arith.subf %13, %11 : vector<8x1xf32>
    %cst_8 = arith.constant 0.000000e+00 : f32
    %15 = vector.broadcast %cst_8 : f32 to vector<8x1xf32>
    %16 = arith.maximumf %14, %15 : vector<8x1xf32>
    %cst_9 = arith.constant 1.000000e+00 : f32
    %17 = vector.broadcast %cst_9 : f32 to vector<8x1xf32>
    %18 = arith.subf %17, %12 : vector<8x1xf32>
    %19 = arith.mulf %18, %10 : vector<8x1xf32>
    %20 = arith.mulf %16, %16 : vector<8x1xf32>
    %21 = arith.mulf %12, %20 : vector<8x1xf32>
    %22 = arith.addf %19, %21 : vector<8x1xf32>
    %c0_10 = arith.constant 0 : index
    %c0_11 = arith.constant 0 : index
    %23 = vector.load %arg6[%c0_10, %c0_11] : memref<8x1xf32, #tpu.memory_space<vmem>>, vector<8x1xf32>
    %24 = arith.addf %23, %22 : vector<8x1xf32>
    %c0_12 = arith.constant 0 : index
    %c0_13 = arith.constant 0 : index
    %25 = vector.load %arg6[%c0_12, %c0_13] : memref<8x1xf32, #tpu.memory_space<vmem>>, vector<8x1xf32>
    tpu.vector_store %arg6[%c0_12, %c0_13], %24 {strides = array<i32>} : memref<8x1xf32, #tpu.memory_space<vmem>>, vector<8x1xf32>,
    %c0_i32_14 = arith.constant 0 : i32
    %26 = arith.cmpi eq, %arg1, %c0_i32_14 : i32
    %27 = arith.extui %26 : i1 to i32
    %c0_i32_15 = arith.constant 0 : i32
    %28 = arith.cmpi ne, %27, %c0_i32_15 : i32
    scf.if %28 {
      %c0_16 = arith.constant 0 : index
      %c0_17 = arith.constant 0 : index
      %29 = vector.load %arg6[%c0_16, %c0_17] : memref<8x1xf32, #tpu.memory_space<vmem>>, vector<8x1xf32>
      %cst_18 = arith.constant dense<0.000000e+00> : vector<1xf32>
      %30 = vector.multi_reduction <add>, %29, %cst_18 [0] : vector<8x1xf32> to vector<1xf32>
      %31 = vector.shape_cast %30 : vector<1xf32> to vector<1x1xf32>
      %32 = vector.shape_cast %31 : vector<1x1xf32> to vector<1x1x1xf32>
      %c0_19 = arith.constant 0 : index
      %c0_20 = arith.constant 0 : index
      %c0_21 = arith.constant 0 : index
      %33 = vector.load %arg5[%c0_19, %c0_20, %c0_21] : memref<1x1x1xf32, #tpu.memory_space<vmem>>, vector<1x1x1xf32>
      tpu.vector_store %arg5[%c0_19, %c0_20, %c0_21], %32 {strides = array<i32>} : memref<1x1x1xf32, #tpu.memory_space<vmem>>, vector<1x1x1xf32>,
    } else {
    }
    return
  }
  func.func @transform_0(%arg0: i32, %arg1: i32) -> (i32, i32) {
    %c1_i32 = arith.constant 1 : i32
    %0 = arith.muli %arg0, %c1_i32 : i32
    %1 = arith.addi %0, %arg1 : i32
    %c0_i32 = arith.constant 0 : i32
    %c0_i32_0 = arith.constant 0 : i32
    return %1, %c0_i32 : i32, i32
  }
  func.func @transform_1(%arg0: i32, %arg1: i32) -> (i32, i32) {
    %c1_i32 = arith.constant 1 : i32
    %0 = arith.muli %arg0, %c1_i32 : i32
    %1 = arith.addi %0, %arg1 : i32
    %c0_i32 = arith.constant 0 : i32
    %c0_i32_0 = arith.constant 0 : i32
    return %1, %c0_i32 : i32, i32
  }
  func.func @transform_2(%arg0: i32, %arg1: i32) -> (i32, i32) {
    %c1_i32 = arith.constant 1 : i32
    %0 = arith.muli %arg0, %c1_i32 : i32
    %1 = arith.addi %0, %arg1 : i32
    %c0_i32 = arith.constant 0 : i32
    %c0_i32_0 = arith.constant 0 : i32
    return %1, %c0_i32 : i32, i32
  }
  func.func @transform_3(%arg0: i32, %arg1: i32) -> (i32, i32, i32) {
    %c0_i32 = arith.constant 0 : i32
    %c0_i32_0 = arith.constant 0 : i32
    %c0_i32_1 = arith.constant 0 : i32
    return %arg0, %c0_i32, %c0_i32_0 : i32, i32, i32
  }
}

</mosaic_0001>

<bundles_post_ra>
// kernel: tpu_custom_call.1
= control target key start
LH: loop header
LB: loop body
LE: loop exit
PB: predicated region body
PF: predicated region fallthrough
CT: control target
= control target key end

     0   :  { %8 = vsyncpa [#allocation4], 0  ;;  %s248_s0 = inlined_call_operand.vmem [shape: f32[8,32], index: 0, kind: input, shape index: {}]   ;;  %s249_s1 = inlined_call_operand.hbm [shape: f32[8,32], index: 1, kind: input, shape index: {}]   ;;  %s250_s2 = inlined_call_operand.vmem [shape: f32[8,1], index: 2, kind: input, shape index: {}]   ;;  %s251_s3 = inlined_call_operand.hbm [shape: f32[1,1,1], index: 3, kind: output, shape index: {}]  }
   0x1   :  { %9 = vsyncpa [#allocation5], 0  ;;  %s192_s12 = smov [#allocation3]   ;;  %s144_s16 = scalar_lea.hbm %s249_s1, 128 }
   0x2   :  { %s27_s13 = sshll.u32 %s192_s12, 4  ;;  %p145_p0 = scmp.ne.s32.totalorder %s249_s1, %s144_s16  ;;  %s28_s13 = int_to_ptr.vmem [resolvable:$true] %s27_s13 }
   0x3   :  { %p148_p1 = scmp.lt.u32.totalorder %s144_s16, %s249_s1 }
   0x5   :  { %p150_p2 = pnand %p148_p1, %p145_p0 }
   0x7   :  { %153 = shalt.err (!%p150_p2)
}
   0x8   :  { %s154_s21 = scalar_lea.vmem %s28_s13, 128  ;;  %p159_p4 = scmp.lt.s32.totalorder %s28_s13, %s28_s13 }
   0x9   :  { %p155_p3 = scmp.ne.s32.totalorder %s28_s13, %s154_s21  ;;  %p160_p5 = scmp.lt.s32.totalorder %s154_s21, %s154_s21 }
   0xb   :  { %p161_p6 = por %p160_p5, %p159_p4 }
   0xd   :  { %p162_p7 = pnand %p161_p6, %p155_p3 }
   0xf   :  { %165 = shalt.err (!%p162_p7)
}
  0x10   :  { %30 = dma.hbm_to_vmem [thread:$0]  %s249_s1, 128, %s28_s13, [#allocation4]  }
  0x11   :  { %188 = dma.done.wait [#allocation4], 128  }
  0x12   :  { %189 = vsyncadd [#allocation4], 4294967168  ;;  %v71_v0 = vld [vmem:[%s248_s0] sm:$0xff]  ;;  %v72_v1 = vld [vmem:[#allocation3] sm:$0xff]  ;;  %vm76_vm0 = vcmask 261120   ;;  %vm69_vm1 = vcmask 7168  }
  0x13   :  { %v73_v2 = vsub.f32 %v71_v0, %v72_v1  ;;  %v193_v6 = vmov 0.0   ;;  %v87_v13 = vld [vmem:[%s250_s2] sm:$0xff]  ;;  %s194_s26 = smov [#allocation6]   ;;  %vm110_vm4 = vcmask 0  }
  0x14   :  { %70 = vst.msk [vmem:[#allocation2] sm:$0xff] %vm69_vm1, %v193_v6  ;;  %v90_v16 = vsub.f32 1.0, %v87_v13  ;;  %s118_s2 = sshll.u32 %s194_s26, 4  ;;  %s119_s2 = int_to_ptr.vmem [resolvable:$true] %s118_s2 }
  0x15   :  { %v74_v3 = vadd.f32 1e-06, %v73_v2  ;;  %s166_s27 = scalar_lea.vmem %s119_s2, 16  ;;  %s170_s28 = scalar_lea.vmem %s119_s2, 32 }
  0x16   :  { %p167_p8 = scmp.ne.s32.totalorder %s119_s2, %s166_s27  ;;  %p171_p9 = scmp.lt.s32.totalorder %s119_s2, %s119_s2 }
  0x17   :  { %v75_v4 = vmul.f32 %v74_v3, %v74_v3  ;;  %p172_p10 = scmp.lt.s32.totalorder %s170_s28, %s166_s27 }
  0x19   :  { %v77_v5 = vsel %vm76_vm0, %v75_v4, 0.0  ;;  %p173_p11 = por %p172_p10, %p171_p9 }
  0x1a   :  { %78 = vadd.xlane.f32.xlu0 %v77_v5 }
  0x1b   :  { %v95_v20 = vld [vmem:[#allocation2] sm:$0xff]  ;;  %p174_p12 = pnand %p173_p11, %p167_p8 }
  0xa7   :  { %v79_v7 = vpop.xlane.xlu0 %78 }
  0xa8   :  { %142 = vrsqrt.f32 %v79_v7  ;;  %vm82_vm2 = vcmp.eq.f32.partialorder %v79_v7, inf  ;;  %v85_v10 = vand.u32 2147483648, %v79_v7  ;;  %vm84_vm3 = vcmp.eq.f32.partialorder %v79_v7, 0.0 }
  0xa9   :  { %v91_v18 = vmul.f32 %v90_v16, %v79_v7 }
  0xb2   :  { %v143_v8 = vpop.eup %142 }
  0xb3   :  { %v81_v9 = vmul.f32 %v143_v8, %v79_v7 }
  0xb5   :  { %v83_v11 = vsel %vm82_vm2, %v79_v7, %v81_v9 }
  0xb6   :  { %v86_v12 = vsel %vm84_vm3, %v85_v10, %v83_v11 }
  0xb7   :  { %v88_v14 = vsub.f32 1.0, %v86_v12 }
  0xb9   :  { %v89_v15 = vmax.f32 %v88_v14, 0.0 }
  0xbb   :  { %v92_v17 = vmul.f32 %v89_v15, %v89_v15 }
  0xbd   :  { %v93_v19 = vmul.f32 %v92_v17, %v87_v13 }
  0xbf   :  { %v94_v21 = vadd.f32 %v93_v19, %v91_v18 }
  0xc1   :  { %v96_v22 = vadd.f32 %v95_v20, %v94_v21 }
  0xc3   :  { %98 = vst.msk [vmem:[#allocation2] sm:$0xff] %vm69_vm1, %v96_v22 }
  0xca   :  { %v102_v23 = vld [vmem:[#allocation2] sm:$0xff] }
  0xcb   :  { %v103_v24 = vsel %vm69_vm1, %v102_v23, 0.0 }
  0xcc   :  { %v104_v25 = vrot.slane %v103_v24, 4 }
  0xce   :  { %v105_v26 = vadd.f32 %v104_v25, %v103_v24 }
  0xd0   :  { %v106_v27 = vrot.slane %v105_v26, 2 }
  0xd2   :  { %v107_v28 = vadd.f32 %v106_v27, %v105_v26 }
  0xd4   :  { %v108_v29 = vrot.slane %v107_v28, 1 }
  0xd6   :  { %v109_v30 = vadd.f32 %v108_v29, %v107_v28 }
  0xd8   :  { %111 = vst.msk [vmem:[#allocation6] sm:$0x1] %vm110_vm4, %v109_v30 }
  0xd9   :  { %177 = shalt.err (!%p174_p12)
}
  0xda   :  { %s178_s4 = scalar_lea.hbm %s251_s3, 16 }
  0xdb   :  { %p179_p13 = scmp.ne.s32.totalorder %s251_s3, %s178_s4  ;;  %p182_p0 = scmp.lt.u32.totalorder %s178_s4, %s251_s3 }
  0xdd   :  { %p184_p1 = pnand %p182_p0, %p179_p13 }
  0xdf   :  { %187 = shalt.err (!%p184_p1)
}
  0xe0   :  { %121 = dma.vmem_to_hbm [thread:$0]  %s119_s2, 16, %s251_s3, [#allocation5]  }
  0xe1   :  { %190 = dma.done.wait [#allocation5], 16  }
  0xe2   :  { %191 = vsyncadd [#allocation5], 4294967280 }
  0xe3   :  { %125 = vsyncpa [#allocation4], 1 }
  0xe4   :  { %126 = vsyncpa [#allocation5], 1 }

</bundles_post_ra>
